<compile_context>
chip_gen: v6e
topology: v6e:2x2x1
jax: 0.10.0
libtpu: 0.0.40
codegen_flags: <defaults>
</compile_context>

<pallas_src>
import functools

import jax
import jax.numpy as jnp
from jax.experimental import pallas as pl
from jax.experimental.pallas import tpu as pltpu


def _round_up(x, m):
    return ((x + m - 1) // m) * m


def _decoder_mlp_kernel(h_ref, x_ref, wgh_ref, wgx_ref, bg_ref,
                        wbig_ref, wxbd_ref, bt_ref, out_ref):
    # Global MLP + sigmoid, with the activation concat expressed as a
    # split-weight sum (no lane concatenation in-kernel).
    ctx = jax.nn.sigmoid(
        jnp.dot(h_ref[...], wgh_ref[...], preferred_element_type=jnp.float32)
        + jnp.dot(x_ref[...], wgx_ref[...], preferred_element_type=jnp.float32)
        + bg_ref[...])

    # All P prediction steps, both heads (local+bridge fused), ca term and
    # biases folded in: two MXU dots + one lane-dense store.
    out = (jnp.dot(ctx, wbig_ref[...], preferred_element_type=jnp.float32)
           + jnp.dot(x_ref[...], wxbd_ref[...], preferred_element_type=jnp.float32)
           + bt_ref[...])
    out_ref[...] = out.astype(out_ref.dtype)


def decoder_mlp_forward(hidden_states, x_future, params, *, context_size,
                        pred_long, num_quantiles, bridge_size, tile_b=None):
    """Pallas-backed equivalent of Decoder_MLP.forward."""
    B, H = hidden_states.shape
    X = x_future.shape[2]
    P, C, Q, Br = pred_long, context_size, num_quantiles, bridge_size
    F = Q + Br
    G_out = C * (P + 1)

    wg, bg, wl, bl, wb, bb = params

    # --- weight prep (runs in XLA once per trace; exact algebraic rewrite) ---
    # Split the global weight so we never materialize cat(hidden, x_flat).
    wg_h = wg[:H]                      # (H, G_out)
    wg_x = wg[H:]                      # (X*P, G_out)

    # Fuse local + bridge heads along the output dimension.
    w_loc = jnp.concatenate([wl, wb], axis=1)      # (2C+X, F)
    b_loc = jnp.concatenate([bl, bb], axis=1)      # (1, F)
    w_ck, w_ca, w_x = w_loc[:C], w_loc[C:2 * C], w_loc[2 * C:]

    # Block-diagonal "all steps at once" weights + tiled invariant terms.
    eye_p = jnp.eye(P, dtype=w_loc.dtype)
    w_big_top = jnp.einsum('pq,cf->pcqf', eye_p, w_ck).reshape(C * P, P * F)
    w_big = jnp.concatenate([w_big_top, jnp.tile(w_ca, (1, P))], axis=0)  # (G_out, P*F)
    w_x_bd = jnp.einsum('pq,xf->pxqf', eye_p, w_x).reshape(X * P, P * F)
    b_tiled = jnp.tile(b_loc, (1, P))                                     # (1, P*F)

    x_flat = x_future.reshape(B, P * X)

    # --- batch tiling (grid over batch, weights stay resident) ---
    if tile_b is None:
        # Keep tiles modest so double-buffered activations fit v7x's 64 MiB
        # VMEM as well as v5e/v6e's 128 MiB; small batches are padded to a
        # sublane-friendly multiple of 8.
        tile_b = min(_round_up(B, 8), 256)
    B_pad = _round_up(B, tile_b)
    if B_pad != B:
        hidden_p = jnp.pad(hidden_states, ((0, B_pad - B), (0, 0)))
        x_flat_p = jnp.pad(x_flat, ((0, B_pad - B), (0, 0)))
    else:
        hidden_p, x_flat_p = hidden_states, x_flat

    grid = (B_pad // tile_b,)

    def batch_spec(cols):
        return pl.BlockSpec((tile_b, cols), lambda b: (b, 0))

    def full_spec(arr):
        return pl.BlockSpec(arr.shape, lambda b: (0, 0))

    flops = 2 * B * (H + X * P) * G_out + 2 * B * P * (2 * C + X) * F
    bytes_accessed = 4 * (B * (H + X * P) + int(wg_h.size) + int(wg_x.size)
                          + int(bg.size) + int(w_big.size) + int(w_x_bd.size)
                          + int(b_tiled.size) + B * P * F)
    cost = pl.CostEstimate(flops=flops, transcendentals=B * G_out,
                           bytes_accessed=bytes_accessed)

    out = pl.pallas_call(
        _decoder_mlp_kernel,
        out_shape=jax.ShapeDtypeStruct((B_pad, P * F), jnp.float32),
        grid=grid,
        in_specs=[batch_spec(H), batch_spec(P * X),
                  full_spec(wg_h), full_spec(wg_x), full_spec(bg),
                  full_spec(w_big), full_spec(w_x_bd), full_spec(b_tiled)],
        out_specs=batch_spec(P * F),
        compiler_params=pltpu.CompilerParams(
            dimension_semantics=("parallel",)),
        cost_estimate=cost,
    )(hidden_p, x_flat_p, wg_h, wg_x, bg, w_big, w_x_bd, b_tiled)

    out = out[:B].reshape(B, P, F)
    # Un-fuse the heads in the (cheap) XLA epilogue.
    return out[:, :, :Q], out[:, :, Q:]


def init_params(key, *, x_dim, hidden_size, context_size, num_quantiles,
                pred_long, bridge_size):
    """kaiming_normal_(mode='fan_out', relu) init, biases = 0.

    PyTorch Linear weight is (out, in); fan_out = out_features, so
    std = sqrt(2 / out_features). We store weights transposed as (in, out).
    """
    def kaiming_t(k, in_f, out_f):
        std = (2.0 / out_f) ** 0.5
        w = jax.random.normal(k, (out_f, in_f), dtype=jnp.float32) * std
        return w.T  # (in, out)

    k1, k2, k3 = jax.random.split(key, 3)
    g_in = hidden_size + x_dim * pred_long
    g_out = context_size * (pred_long + 1)
    l_in = context_size * 2 + x_dim

    wg = kaiming_t(k1, g_in, g_out)
    bg = jnp.zeros((1, g_out), jnp.float32)
    wl = kaiming_t(k2, l_in, num_quantiles)
    bl = jnp.zeros((1, num_quantiles), jnp.float32)
    wb = kaiming_t(k3, l_in, bridge_size)
    bb = jnp.zeros((1, bridge_size), jnp.float32)
    return (wg, bg, wl, bl, wb, bb)


def reference_forward(hidden_states, x_future, params, *, context_size,
                      pred_long):
    """Pure-JAX reference mirroring the PyTorch forward."""
    wg, bg, wl, bl, wb, bb = params
    B = hidden_states.shape[0]
    x_flat = x_future.reshape(B, -1)
    hf = jnp.concatenate([hidden_states, x_flat], axis=1)
    ctx = jax.nn.sigmoid(hf @ wg + bg)
    C = context_size
    ca = ctx[:, C * pred_long:]
    results, bridges = [], []
    for k in range(pred_long):
        xk = x_future[:, k, :]
        ck = ctx[:, k * C:(k + 1) * C]
        cak = jnp.concatenate([ck, ca, xk], axis=1)
        results.append((cak @ wl + bl)[:, None, :])
        bridges.append((cak @ wb + bb)[:, None, :])
    return jnp.concatenate(results, axis=1), jnp.concatenate(bridges, axis=1)


if __name__ == "__main__":
    # Small synthetic configuration.
    B = 2
    x_dim = 4
    hidden_size = 32
    context_size = 16
    num_quantiles = 5
    pred_long = 8
    bridge_size = 16

    key = jax.random.PRNGKey(0)
    kp, kh, kx = jax.random.split(key, 3)

    params = init_params(kp, x_dim=x_dim, hidden_size=hidden_size,
                         context_size=context_size,
                         num_quantiles=num_quantiles,
                         pred_long=pred_long, bridge_size=bridge_size)

    hidden_states = jax.random.normal(kh, (B, hidden_size), dtype=jnp.float32)
    x_future = jax.random.normal(kx, (B, pred_long, x_dim), dtype=jnp.float32)

    fwd = jax.jit(functools.partial(
        decoder_mlp_forward,
        context_size=context_size, pred_long=pred_long,
        num_quantiles=num_quantiles, bridge_size=bridge_size))

    result, bridge = fwd(hidden_states, x_future, params)
    jax.block_until_ready((result, bridge))

    # Correctness check against the pure-JAX reference.
    ref_result, ref_bridge = reference_forward(
        hidden_states, x_future, params,
        context_size=context_size, pred_long=pred_long)

    assert result.shape == (B, pred_long, num_quantiles)
    assert bridge.shape == (B, pred_long, bridge_size)
    assert jnp.allclose(result, ref_result, atol=1e-4, rtol=1e-5)
    assert jnp.allclose(bridge, ref_bridge, atol=1e-4, rtol=1e-5)

    print("KERNEL_OK")
</pallas_src>

<mosaic_0001>
module attributes {stable_mosaic.version = 11 : i64} {
  func.func @_decoder_mlp_kernel(%arg0: i32, %arg1: memref<8x32xf32, #tpu.memory_space<vmem>>, %arg2: memref<8x32xf32, #tpu.memory_space<vmem>>, %arg3: memref<32x144xf32, #tpu.memory_space<vmem>>, %arg4: memref<32x144xf32, #tpu.memory_space<vmem>>, %arg5: memref<1x144xf32, #tpu.memory_space<vmem>>, %arg6: memref<144x168xf32, #tpu.memory_space<vmem>>, %arg7: memref<32x168xf32, #tpu.memory_space<vmem>>, %arg8: memref<1x168xf32, #tpu.memory_space<vmem>>, %arg9: memref<8x168xf32, #tpu.memory_space<vmem>>) attributes {dimension_semantics = [#tpu.dimension_semantics<parallel>], iteration_bounds = array<i64: 1>, scalar_prefetch = 0 : i64, scratch_operands = 0 : i64, tpu.core_type = #tpu.core_type<tc>, window_params = [{transform_indices = @transform_0, window_bounds = array<i64: 8, 32>}, {transform_indices = @transform_1, window_bounds = array<i64: 8, 32>}, {pipeline_mode = #tpu.pipeline_mode<synchronous>, transform_indices = @transform_2, window_bounds = array<i64: 32, 144>}, {pipeline_mode = #tpu.pipeline_mode<synchronous>, transform_indices = @transform_3, window_bounds = array<i64: 32, 144>}, {pipeline_mode = #tpu.pipeline_mode<synchronous>, transform_indices = @transform_4, window_bounds = array<i64: 1, 144>}, {pipeline_mode = #tpu.pipeline_mode<synchronous>, transform_indices = @transform_5, window_bounds = array<i64: 144, 168>}, {pipeline_mode = #tpu.pipeline_mode<synchronous>, transform_indices = @transform_6, window_bounds = array<i64: 32, 168>}, {pipeline_mode = #tpu.pipeline_mode<synchronous>, transform_indices = @transform_7, window_bounds = array<i64: 1, 168>}, {transform_indices = @transform_8, window_bounds = array<i64: 8, 168>}]} {
    %c0 = arith.constant 0 : index
    %c0_0 = arith.constant 0 : index
    %0 = vector.load %arg1[%c0, %c0_0] : memref<8x32xf32, #tpu.memory_space<vmem>>, vector<8x32xf32>
    %c0_1 = arith.constant 0 : index
    %c0_2 = arith.constant 0 : index
    %1 = vector.load %arg3[%c0_1, %c0_2] : memref<32x144xf32, #tpu.memory_space<vmem>>, vector<32x144xf32>
    %cst = arith.constant dense<0.000000e+00> : vector<8x144xf32>
    %2 = tpu.matmul %0, %1, %cst {dimension_numbers = #tpu.dot_dimension_numbers<[1], [0], [0], [1], [0, 0, 1, 1], [], []>} : vector<8x32xf32>, vector<32x144xf32>, vector<8x144xf32> -> vector<8x144xf32>
    %c0_3 = arith.constant 0 : index
    %c0_4 = arith.constant 0 : index
    %3 = vector.load %arg2[%c0_3, %c0_4] : memref<8x32xf32, #tpu.memory_space<vmem>>, vector<8x32xf32>
    %c0_5 = arith.constant 0 : index
    %c0_6 = arith.constant 0 : index
    %4 = vector.load %arg4[%c0_5, %c0_6] : memref<32x144xf32, #tpu.memory_space<vmem>>, vector<32x144xf32>
    %cst_7 = arith.constant dense<0.000000e+00> : vector<8x144xf32>
    %5 = tpu.matmul %3, %4, %cst_7 {dimension_numbers = #tpu.dot_dimension_numbers<[1], [0], [0], [1], [0, 0, 1, 1], [], []>} : vector<8x32xf32>, vector<32x144xf32>, vector<8x144xf32> -> vector<8x144xf32>
    %6 = arith.addf %2, %5 : vector<8x144xf32>
    %c0_8 = arith.constant 0 : index
    %c0_9 = arith.constant 0 : index
    %7 = vector.load %arg5[%c0_8, %c0_9] : memref<1x144xf32, #tpu.memory_space<vmem>>, vector<1x144xf32>
    %8 = vector.broadcast %7 : vector<1x144xf32> to vector<8x144xf32>
    %9 = arith.addf %6, %8 : vector<8x144xf32>
    %10 = arith.negf %9 : vector<8x144xf32>
    %11 = math.exp %10 : vector<8x144xf32>
    %cst_10 = arith.constant 1.000000e+00 : f32
    %12 = vector.broadcast %cst_10 : f32 to vector<8x144xf32>
    %13 = arith.addf %12, %11 : vector<8x144xf32>
    %14 = arith.divf %12, %13 : vector<8x144xf32>
    %c0_11 = arith.constant 0 : index
    %c0_12 = arith.constant 0 : index
    %15 = vector.load %arg6[%c0_11, %c0_12] : memref<144x168xf32, #tpu.memory_space<vmem>>, vector<144x168xf32>
    %cst_13 = arith.constant dense<0.000000e+00> : vector<8x168xf32>
    %16 = tpu.matmul %14, %15, %cst_13 {dimension_numbers = #tpu.dot_dimension_numbers<[1], [0], [0], [1], [0, 0, 1, 1], [], []>} : vector<8x144xf32>, vector<144x168xf32>, vector<8x168xf32> -> vector<8x168xf32>
    %c0_14 = arith.constant 0 : index
    %c0_15 = arith.constant 0 : index
    %17 = vector.load %arg2[%c0_14, %c0_15] : memref<8x32xf32, #tpu.memory_space<vmem>>, vector<8x32xf32>
    %c0_16 = arith.constant 0 : index
    %c0_17 = arith.constant 0 : index
    %18 = vector.load %arg7[%c0_16, %c0_17] : memref<32x168xf32, #tpu.memory_space<vmem>>, vector<32x168xf32>
    %cst_18 = arith.constant dense<0.000000e+00> : vector<8x168xf32>
    %19 = tpu.matmul %17, %18, %cst_18 {dimension_numbers = #tpu.dot_dimension_numbers<[1], [0], [0], [1], [0, 0, 1, 1], [], []>} : vector<8x32xf32>, vector<32x168xf32>, vector<8x168xf32> -> vector<8x168xf32>
    %20 = arith.addf %16, %19 : vector<8x168xf32>
    %c0_19 = arith.constant 0 : index
    %c0_20 = arith.constant 0 : index
    %21 = vector.load %arg8[%c0_19, %c0_20] : memref<1x168xf32, #tpu.memory_space<vmem>>, vector<1x168xf32>
    %22 = vector.broadcast %21 : vector<1x168xf32> to vector<8x168xf32>
    %23 = arith.addf %20, %22 : vector<8x168xf32>
    %c0_21 = arith.constant 0 : index
    %c0_22 = arith.constant 0 : index
    %24 = vector.load %arg9[%c0_21, %c0_22] : memref<8x168xf32, #tpu.memory_space<vmem>>, vector<8x168xf32>
    tpu.vector_store %arg9[%c0_21, %c0_22], %23 {strides = array<i32>} : memref<8x168xf32, #tpu.memory_space<vmem>>, vector<8x168xf32>,
    return
  }
  func.func @transform_0(%arg0: i32) -> (i32, i32) {
    %c0_i32 = arith.constant 0 : i32
    %c0_i32_0 = arith.constant 0 : i32
    return %arg0, %c0_i32 : i32, i32
  }
  func.func @transform_1(%arg0: i32) -> (i32, i32) {
    %c0_i32 = arith.constant 0 : i32
    %c0_i32_0 = arith.constant 0 : i32
    return %arg0, %c0_i32 : i32, i32
  }
  func.func @transform_2(%arg0: i32) -> (i32, i32) {
    %c0_i32 = arith.constant 0 : i32
    %c0_i32_0 = arith.constant 0 : i32
    %c0_i32_1 = arith.constant 0 : i32
    return %c0_i32, %c0_i32_0 : i32, i32
  }
  func.func @transform_3(%arg0: i32) -> (i32, i32) {
    %c0_i32 = arith.constant 0 : i32
    %c0_i32_0 = arith.constant 0 : i32
    %c0_i32_1 = arith.constant 0 : i32
    return %c0_i32, %c0_i32_0 : i32, i32
  }
  func.func @transform_4(%arg0: i32) -> (i32, i32) {
    %c0_i32 = arith.constant 0 : i32
    %c0_i32_0 = arith.constant 0 : i32
    %c0_i32_1 = arith.constant 0 : i32
    return %c0_i32, %c0_i32_0 : i32, i32
  }
  func.func @transform_5(%arg0: i32) -> (i32, i32) {
    %c0_i32 = arith.constant 0 : i32
    %c0_i32_0 = arith.constant 0 : i32
    %c0_i32_1 = arith.constant 0 : i32
    return %c0_i32, %c0_i32_0 : i32, i32
  }
  func.func @transform_6(%arg0: i32) -> (i32, i32) {
    %c0_i32 = arith.constant 0 : i32
    %c0_i32_0 = arith.constant 0 : i32
    %c0_i32_1 = arith.constant 0 : i32
    return %c0_i32, %c0_i32_0 : i32, i32
  }
  func.func @transform_7(%arg0: i32) -> (i32, i32) {
    %c0_i32 = arith.constant 0 : i32
    %c0_i32_0 = arith.constant 0 : i32
    %c0_i32_1 = arith.constant 0 : i32
    return %c0_i32, %c0_i32_0 : i32, i32
  }
  func.func @transform_8(%arg0: i32) -> (i32, i32) {
    %c0_i32 = arith.constant 0 : i32
    %c0_i32_0 = arith.constant 0 : i32
    return %arg0, %c0_i32 : i32, i32
  }
}

</mosaic_0001>

<bundles_post_ra>
// kernel: tile.14
= control target key start
LH: loop header
LB: loop body
LE: loop exit
PB: predicated region body
PF: predicated region fallthrough
CT: control target
= control target key end

     0   :  { %vm4_vm0 = vcmask 1047556   ;;  %vm29_vm1 = vcmask 15360   ;;  %s239_s14 = smov 105   ;;  %s240_s27 = smov 126   ;;  %vm6_vm2 = vcmask 171008   ;;  %vm33_vm3 = vcmask 154624   ;;  %s440_s0 = inlined_call_operand.vmem [shape: f32[16,8,21], index: 0, kind: input, shape index: {}]   ;;  %s441_s1 = inlined_call_operand.vmem [shape: f32[16,168], index: 1, kind: output, shape index: {}]  }
   0x1   :  { %v201_v0 = vld [vmem:[%s440_s0 + $0x5] ss:$8 sm:$0xf]   ;;  %v190_v3 = vld [vmem:[%s440_s0 + $0x6] ss:$8 sm:$0xf]  }
   0x2   :  { %v202_v1 = vld [vmem:[%s440_s0 + $0x5] ss:$8 sm:$0xf0]   ;;  %v191_v4 = vld [vmem:[%s440_s0 + $0x6] ss:$8 sm:$0xf0]  }
   0x3   :  { %v65_v2 = vsel %vm4_vm0, %v202_v1, %v201_v0  ;;  %v22_v5 = vsel %vm4_vm0, %v191_v4, %v190_v3  ;;  %v192_v6 = vld [vmem:[%s440_s0 + $0x6] ss:$8 sm:$0xf]   ;;  %v203_v9 = vld [vmem:[%s440_s0 + $0x45] ss:$8 sm:$0xf]  }
   0x4   :  { %66 = vrot.lane.b32.xlu1 %v65_v2, %s239_s14  ;;  %v193_v7 = vld [vmem:[%s440_s0 + $0x6] ss:$8 sm:$0xf0]   ;;  %v204_v10 = vld [vmem:[%s440_s0 + $0x45] ss:$8 sm:$0xf0]  }
   0x5   :  { %v28_v8 = vsel %vm4_vm0, %v193_v7, %v192_v6  ;;  %v75_v12 = vsel %vm4_vm0, %v204_v10, %v203_v9  ;;  %v195_v13 = vld [vmem:[%s440_s0 + $0x46] ss:$8 sm:$0xf]   ;;  %v208_v19 = vld [vmem:[%s440_s0 + $0x44] ss:$8 sm:$0xf]  }
   0x6   :  { %v30_v11 = vsel %vm29_vm1, %v28_v8, %v22_v5  ;;  %v196_v14 = vld [vmem:[%s440_s0 + $0x46] ss:$8 sm:$0xf0]   ;;  %v209_v21 = vld [vmem:[%s440_s0 + $0x44] ss:$8 sm:$0xf0]  }
   0x7   :  { %31 = vrot.lane.b32.xlu0 %v30_v11, %s240_s27  ;;  %v43_v15 = vsel %vm4_vm0, %v196_v14, %v195_v13  ;;  %v197_v16 = vld [vmem:[%s440_s0 + $0x46] ss:$8 sm:$0xf]   ;;  %v206_v22 = vld [vmem:[%s440_s0 + $0x4] ss:$8 sm:$0xf]   ;;  %v96_v23 = vsel %vm4_vm0, %v209_v21, %v208_v19 }
   0x8   :  { %v198_v17 = vld [vmem:[%s440_s0 + $0x46] ss:$8 sm:$0xf0]   ;;  %76 = vrot.lane.b32.xlu1 %v75_v12, %s239_s14  ;;  %v207_v24 = vld [vmem:[%s440_s0 + $0x4] ss:$8 sm:$0xf0]  }
   0x9   :  { %v49_v18 = vsel %vm4_vm0, %v198_v17, %v197_v16  ;;  %v213_v25 = vld [vmem:[%s440_s0 + $0x43] ss:$8 sm:$0xf]   ;;  %s241_s15 = smov 84   ;;  %v86_v27 = vsel %vm4_vm0, %v207_v24, %v206_v22  ;;  %s242_s24 = smov 63   ;;  %vm36_vm4 = vcmask 1048560  }
   0xa   :  { %v51_v20 = vsel %vm29_vm1, %v49_v18, %v43_v15  ;;  %v214_v26 = vld [vmem:[%s440_s0 + $0x43] ss:$8 sm:$0xf0]   ;;  %v218_v31 = vld [vmem:[%s440_s0 + $0x42] ss:$8 sm:$0xf]  }
   0xb   :  { %52 = vrot.lane.b32.xlu0 %v51_v20, %s240_s27  ;;  %v117_v28 = vsel %vm4_vm0, %v214_v26, %v213_v25  ;;  %v211_v29 = vld [vmem:[%s440_s0 + $0x3] ss:$8 sm:$0xf]   ;;  %v219_v32 = vld [vmem:[%s440_s0 + $0x42] ss:$8 sm:$0xf0]  }
   0xc   :  { %97 = vrot.lane.b32.xlu1 %v96_v23, %s241_s15  ;;  %v212_v30 = vld [vmem:[%s440_s0 + $0x3] ss:$8 sm:$0xf0]   ;;  %v138_v34 = vsel %vm4_vm0, %v219_v32, %v218_v31  ;;  %v216_v35 = vld [vmem:[%s440_s0 + $0x2] ss:$8 sm:$0xf]  }
   0xd   :  { %v107_v33 = vsel %vm4_vm0, %v212_v30, %v211_v29  ;;  %v217_v36 = vld [vmem:[%s440_s0 + $0x2] ss:$8 sm:$0xf0]   ;;  %v223_v37 = vld [vmem:[%s440_s0 + $0x41] ss:$8 sm:$0xf]  }
   0xe   :  { %v224_v38 = vld [vmem:[%s440_s0 + $0x41] ss:$8 sm:$0xf0]   ;;  %v2_v40 = vld [vmem:[%s440_s0] ss:$8 sm:$0xf]   ;;  %v128_v41 = vsel %vm4_vm0, %v217_v36, %v216_v35 }
   0xf   :  { %87 = vrot.lane.b32.xlu0 %v86_v27, %s241_s15  ;;  %v221_v39 = vld [vmem:[%s440_s0 + $0x1] ss:$8 sm:$0xf]   ;;  %s243_s8 = smov 42   ;;  %v159_v44 = vsel %vm4_vm0, %v224_v38, %v223_v37  ;;  %s244_s25 = smov 21   ;;  %vm68_vm5 = vcmask 1032008  }
  0x10   :  { %118 = vrot.lane.b32.xlu1 %v117_v28, %s242_s24  ;;  %v3_v42 = vld [vmem:[%s440_s0] ss:$8 sm:$0xf0]   ;;  %v222_v45 = vld [vmem:[%s440_s0 + $0x1] ss:$8 sm:$0xf0]  }
  0x11   :  { %v187_v43 = vld [vmem:[%s440_s0 + $0x40] ss:$8 sm:$0xf]   ;;  %v5_v46 = vsel %vm4_vm0, %v3_v42, %v2_v40  ;;  %v229_v48 = vld [vmem:[%s440_s0 + $0x47] ss:$8 sm:$0xf]   ;;  %v149_v51 = vsel %vm4_vm0, %v222_v45, %v221_v39 }
  0x12   :  { %v188_v47 = vld [vmem:[%s440_s0 + $0x40] ss:$8 sm:$0xf0]   ;;  %v230_v49 = vld [vmem:[%s440_s0 + $0x47] ss:$8 sm:$0xf0]  }
  0x13   :  { %108 = vrot.lane.b32.xlu0 %v107_v33, %s242_s24  ;;  %7 = vst.msk [vmem:[%s441_s1] sm:$0xff] %vm6_vm2, %v5_v46   ;;  %v13_v50 = vsel %vm4_vm0, %v188_v47, %v187_v43  ;;  %v181_v52 = vsel %vm4_vm0, %v230_v49, %v229_v48  ;;  %v226_v53 = vld [vmem:[%s440_s0 + $0x7] ss:$8 sm:$0xf]   ;;  %vm89_vm6 = vcmask 859808   ;;  %vm110_vm7 = vcmask 687608  }
  0x14   :  { %139 = vrot.lane.b32.xlu1 %v138_v34, %s243_s8  ;;  %189 = vst.msk [vmem:[%s441_s1 + $0x10] sm:$0xff] %vm6_vm2, %v13_v50   ;;  %v227_v54 = vld [vmem:[%s440_s0 + $0x7] ss:$8 sm:$0xf0]   ;;  %s245_s0 = smov 19   ;;  %vm131_vm8 = vcmask 515408  }
  0x15   :  { %v170_v55 = vsel %vm4_vm0, %v227_v54, %v226_v53  ;;  %vm152_vm9 = vcmask 343208   ;;  %vm173_vm10 = vcmask 326808  }
  0x17   :  { %129 = vrot.lane.b32.xlu0 %v128_v41, %s243_s8 }
  0x18   :  { %160 = vrot.lane.b32.xlu1 %v159_v44, %s244_s25 }
  0x1b   :  { %150 = vrot.lane.b32.xlu0 %v149_v51, %s244_s25 }
  0x1c   :  { %182 = vrot.lane.b32.xlu1 %v181_v52, %s245_s0 }
  0x1f   :  { %171 = vrot.lane.b32.xlu0 %v170_v55, %s245_s0 }
  0x76   :  { %v67_v56 = vpop.permute.xlu1 %66  }
  0x79   :  { %v32_v57 = vpop.permute.xlu0 %31  }
  0x7a   :  { %194 = vst.msk [vmem:[%s441_s1 + $0x8] sm:$0xff] %vm33_vm3, %v32_v57   ;;  %v77_v58 = vpop.permute.xlu1 %76  }
  0x7b   :  { %37 = vst.msk [vmem:[%s441_s1] sm:$0xff] %vm36_vm4, %v32_v57  }
  0x7c   :  { %69 = vst.msk [vmem:[%s441_s1] sm:$0xff] %vm68_vm5, %v67_v56  }
  0x7d   :  { %v53_v59 = vpop.permute.xlu0 %52  }
  0x7e   :  { %199 = vst.msk [vmem:[%s441_s1 + $0x18] sm:$0xff] %vm33_vm3, %v53_v59   ;;  %v98_v60 = vpop.permute.xlu1 %97  }
  0x7f   :  { %200 = vst.msk [vmem:[%s441_s1 + $0x10] sm:$0xff] %vm36_vm4, %v53_v59  }
  0x80   :  { %205 = vst.msk [vmem:[%s441_s1 + $0x10] sm:$0xff] %vm68_vm5, %v77_v58  }
  0x81   :  { %210 = vst.msk [vmem:[%s441_s1 + $0x10] sm:$0xff] %vm89_vm6, %v98_v60   ;;  %v88_v61 = vpop.permute.xlu0 %87  }
  0x82   :  { %90 = vst.msk [vmem:[%s441_s1] sm:$0xff] %vm89_vm6, %v88_v61   ;;  %v119_v62 = vpop.permute.xlu1 %118  }
  0x83   :  { %215 = vst.msk [vmem:[%s441_s1 + $0x10] sm:$0xff] %vm110_vm7, %v119_v62  }
  0x85   :  { %v109_v63 = vpop.permute.xlu0 %108  }
  0x86   :  { %111 = vst.msk [vmem:[%s441_s1] sm:$0xff] %vm110_vm7, %v109_v63   ;;  %v140_v0 = vpop.permute.xlu1 %139  }
  0x87   :  { %220 = vst.msk [vmem:[%s441_s1 + $0x10] sm:$0xff] %vm131_vm8, %v140_v0  }
  0x89   :  { %v130_v1 = vpop.permute.xlu0 %129  }
  0x8a   :  { %132 = vst.msk [vmem:[%s441_s1] sm:$0xff] %vm131_vm8, %v130_v1   ;;  %v161_v2 = vpop.permute.xlu1 %160  }
  0x8b   :  { %225 = vst.msk [vmem:[%s441_s1 + $0x10] sm:$0xff] %vm152_vm9, %v161_v2  }
  0x8d   :  { %v151_v3 = vpop.permute.xlu0 %150  }
  0x8e   :  { %153 = vst.msk [vmem:[%s441_s1] sm:$0xff] %vm152_vm9, %v151_v3   ;;  %v183_v4 = vpop.permute.xlu1 %182  }
  0x8f   :  { %231 = vst.msk [vmem:[%s441_s1 + $0x18] sm:$0xff] %vm173_vm10, %v183_v4  }
  0x91   :  { %v172_v5 = vpop.permute.xlu0 %171  }
  0x92   :  { %228 = vst.msk [vmem:[%s441_s1 + $0x8] sm:$0xff] %vm173_vm10, %v172_v5  }

// kernel: decoder_mlp_forward.1
= control target key start
LH: loop header
LB: loop body
LE: loop exit
PB: predicated region body
PF: predicated region fallthrough
CT: control target
= control target key end

     0   :  { %v448_v3 = vmov 0.0   ;;  %vm47_vm0 = vcmask 261120   ;;  %v198_v63 = vlaneseq  ;;  %vm337_vm1 = vcmask 130048   ;;  %s699_s3 = inlined_call_operand.vmem [shape: f32[32,144], index: 3, kind: input, shape index: {}]   ;;  %s700_s1 = inlined_call_operand.vmem [shape: f32[8,32], index: 1, kind: input, shape index: {}]   ;;  %s701_s2 = inlined_call_operand.vmem [shape: f32[32,144], index: 2, kind: input, shape index: {}]   ;;  %s702_s0 = inlined_call_operand.vmem [shape: f32[8,32], index: 0, kind: input, shape index: {}]   ;;  %s703_s5 = inlined_call_operand.vmem [shape: f32[144,168], index: 5, kind: input, shape index: {}]   ;;  %s704_s6 = inlined_call_operand.vmem [shape: f32[32,168], index: 6, kind: input, shape index: {}]   ;;  %s705_s4 = inlined_call_operand.vmem [shape: f32[1,144], index: 4, kind: input, shape index: {}]   ;;  %s706_s7 = inlined_call_operand.vmem [shape: f32[1,168], index: 7, kind: input, shape index: {}]   ;;  %s707_s8 = inlined_call_operand.vmem [shape: f32[8,168], index: 8, kind: output, shape index: {}]  }
   0x1   :  { %v46_v0 = vld [vmem:[%s699_s3 + $0x38] sm:$0xff]  ;;  %v45_v1 = vld [vmem:[%s699_s3 + $0x30] sm:$0xff]  ;;  %v44_v2 = vld [vmem:[%s699_s3 + $0x28] sm:$0xff]  ;;  %115 = vmatprep.mubr.f32.mxu0 %v448_v3  ;;  %vm427_vm2 = vcmask 326656  }
   0x2   :  { %75 = vmatprep.subr.mxu0 %v46_v0  ;;  %v43_v4 = vld [vmem:[%s699_s3 + $0x20] sm:$0xff]  ;;  %v42_v5 = vld [vmem:[%s699_s3 + $0x18] sm:$0xff]  ;;  %v41_v6 = vld [vmem:[%s699_s3 + $0x10] sm:$0xff]  ;;  %v199_v0 = vshrl.u32 %v198_v63, 7 }
   0x3   :  { %76 = vmatpush1.msra.mxu0 %v45_v1  ;;  %v40_v7 = vld [vmem:[%s699_s3 + $0x8] sm:$0xff]  ;;  %v39_v8 = vld [vmem:[%s699_s3] sm:$0xff]  ;;  %v37_v10 = vld [vmem:[%s701_s2 + $0x38] sm:$0xff] }
   0x4   :  { %77 = vmatprep.subr.mxu0 %v44_v2  ;;  %v521_v9 = vld [vmem:[%s700_s1] sm:$0xff]  ;;  %v36_v11 = vld [vmem:[%s701_s2 + $0x30] sm:$0xff]  ;;  %v35_v12 = vld [vmem:[%s701_s2 + $0x28] sm:$0xff]  ;;  %v200_v2 = vsub.s32 0, %v199_v0 }
   0x5   :  { %78 = vmatpush1.msra.mxu0 %v43_v4  ;;  %v34_v13 = vld [vmem:[%s701_s2 + $0x20] sm:$0xff]  ;;  %v33_v14 = vld [vmem:[%s701_s2 + $0x18] sm:$0xff]  ;;  %v32_v15 = vld [vmem:[%s701_s2 + $0x10] sm:$0xff]  ;;  %v204_v4 = vsub.s32 1, %v199_v0 }
   0x6   :  { %79 = vmatprep.subr.mxu0 %v42_v5  ;;  %v31_v16 = vld [vmem:[%s701_s2 + $0x8] sm:$0xff]  ;;  %v30_v17 = vld [vmem:[%s701_s2] sm:$0xff]  ;;  %v253_v19 = vld [vmem:[%s703_s5 + $0xf8] sm:$0xff] }
   0x7   :  { %80 = vmatpush1.msra.mxu0 %v41_v6  ;;  %v29_v18 = vld [vmem:[%s702_s0] sm:$0xff]  ;;  %341 = vmatprep.subr.mxu1 %v253_v19  ;;  %v252_v20 = vld [vmem:[%s703_s5 + $0xf0] sm:$0xff]  ;;  %v251_v21 = vld [vmem:[%s703_s5 + $0xe8] sm:$0xff] }
   0x8   :  { %81 = vmatprep.subr.mxu0 %v40_v7  ;;  %342 = vmatpush1.msra.mxu1 %v252_v20  ;;  %v250_v22 = vld [vmem:[%s703_s5 + $0xe0] sm:$0xff]  ;;  %v249_v23 = vld [vmem:[%s703_s5 + $0xd8] sm:$0xff]  ;;  %v248_v24 = vld [vmem:[%s703_s5 + $0xd0] sm:$0xff] }
   0x9   :  { %82 = vmatpush1.msra.mxu0 %v39_v8  ;;  %343 = vmatprep.subr.mxu1 %v251_v21  ;;  %v247_v25 = vld [vmem:[%s703_s5 + $0xc8] sm:$0xff]  ;;  %v246_v26 = vld [vmem:[%s703_s5 + $0xc0] sm:$0xff]  ;;  %v245_v27 = vld [vmem:[%s703_s5 + $0xb8] sm:$0xff] }
   0xa   :  { %433 = vmatmul.mubr.msk.f32.vlgmr.msra.gmra.mxu0 %vm47_vm0, %v521_v9  ;;  %149 = vmatprep.subr.mxu0 %v37_v10  ;;  %v244_v28 = vld [vmem:[%s703_s5 + $0xb0] sm:$0xff]  ;;  %v243_v29 = vld [vmem:[%s703_s5 + $0xa8] sm:$0xff]  ;;  %v242_v30 = vld [vmem:[%s703_s5 + $0xa0] sm:$0xff] }
   0xb   :  { %150 = vmatpush1.msra.mxu0 %v36_v11  ;;  %189 = vmatprep.mubr.f32.mxu0 %v448_v3  ;;  %v241_v31 = vld [vmem:[%s703_s5 + $0x98] sm:$0xff]  ;;  %v240_v32 = vld [vmem:[%s703_s5 + $0x90] sm:$0xff]  ;;  %v239_v33 = vld [vmem:[%s703_s5 + $0x88] sm:$0xff] }
   0xc   :  { %151 = vmatprep.subr.mxu0 %v35_v12  ;;  %344 = vmatpush1.msra.mxu1 %v250_v22  ;;  %v238_v34 = vld [vmem:[%s703_s5 + $0x80] sm:$0xff]  ;;  %v237_v35 = vld [vmem:[%s703_s5 + $0x78] sm:$0xff]  ;;  %v236_v36 = vld [vmem:[%s703_s5 + $0x70] sm:$0xff] }
   0xd   :  { %152 = vmatpush1.msra.mxu0 %v34_v13  ;;  %345 = vmatprep.subr.mxu1 %v249_v23  ;;  %v235_v37 = vld [vmem:[%s703_s5 + $0x68] sm:$0xff]  ;;  %v234_v38 = vld [vmem:[%s703_s5 + $0x60] sm:$0xff]  ;;  %v233_v39 = vld [vmem:[%s703_s5 + $0x58] sm:$0xff] }
   0xe   :  { %153 = vmatprep.subr.mxu0 %v33_v14  ;;  %346 = vmatpush1.msra.mxu1 %v248_v24  ;;  %v232_v40 = vld [vmem:[%s703_s5 + $0x50] sm:$0xff]  ;;  %v231_v41 = vld [vmem:[%s703_s5 + $0x48] sm:$0xff]  ;;  %v230_v42 = vld [vmem:[%s703_s5 + $0x40] sm:$0xff] }
   0xf   :  { %154 = vmatpush1.msra.mxu0 %v32_v15  ;;  %347 = vmatprep.subr.mxu1 %v247_v25  ;;  %v229_v43 = vld [vmem:[%s703_s5 + $0x38] sm:$0xff]  ;;  %v228_v44 = vld [vmem:[%s703_s5 + $0x30] sm:$0xff]  ;;  %v227_v46 = vld [vmem:[%s703_s5 + $0x28] sm:$0xff] }
  0x10   :  { %155 = vmatprep.subr.mxu0 %v31_v16  ;;  %348 = vmatpush1.msra.mxu1 %v246_v26  ;;  %v265_v45 = vld [vmem:[%s704_s6 + $0x38] sm:$0xff]  ;;  %v264_v47 = vld [vmem:[%s704_s6 + $0x30] sm:$0xff]  ;;  %v263_v48 = vld [vmem:[%s704_s6 + $0x28] sm:$0xff] }
  0x11   :  { %156 = vmatpush1.msra.mxu0 %v30_v17  ;;  %349 = vmatprep.subr.mxu1 %v245_v27  ;;  %v226_v49 = vld [vmem:[%s703_s5 + $0x20] sm:$0xff]  ;;  %v225_v51 = vld [vmem:[%s703_s5 + $0x18] sm:$0xff]  ;;  %v260_v53 = vld [vmem:[%s704_s6 + $0x10] sm:$0xff] }
  0x12   :  { %434 = vmatmul.mubr.msk.f32.vlgmr.msra.gmra.mxu0 %vm47_vm0, %v29_v18  ;;  %350 = vmatpush1.msra.mxu1 %v244_v28  ;;  %v262_v50 = vld [vmem:[%s704_s6 + $0x20] sm:$0xff]  ;;  %v261_v52 = vld [vmem:[%s704_s6 + $0x18] sm:$0xff]  ;;  %v224_v54 = vld [vmem:[%s703_s5 + $0x10] sm:$0xff] }
  0x13   :  { %330 = vmatprep.mubr.f32.mxu0 %v448_v3  ;;  %351 = vmatprep.subr.mxu1 %v243_v29  ;;  %v259_v55 = vld [vmem:[%s704_s6 + $0x8] sm:$0xff]  ;;  %v258_v57 = vld [vmem:[%s704_s6] sm:$0xff]  ;;  %v257_v59 = vld [vmem:[%s703_s5 + $0x118] sm:$0xff] }
  0x14   :  { %352 = vmatpush1.msra.mxu1 %v242_v30  ;;  %290 = vmatprep.subr.mxu0 %v265_v45  ;;  %v223_v56 = vld [vmem:[%s703_s5 + $0x8] sm:$0xff]  ;;  %v222_v58 = vld [vmem:[%s703_s5] sm:$0xff]  ;;  %v256_v60 = vld [vmem:[%s703_s5 + $0x110] sm:$0xff] }
  0x15   :  { %353 = vmatprep.subr.mxu1 %v241_v31  ;;  %291 = vmatpush1.msra.mxu0 %v264_v47  ;;  %v255_v61 = vld [vmem:[%s703_s5 + $0x108] sm:$0xff]  ;;  %v254_v62 = vld [vmem:[%s703_s5 + $0x100] sm:$0xff] }
  0x16   :  { %354 = vmatpush1.msra.mxu1 %v240_v32  ;;  %292 = vmatprep.subr.mxu0 %v263_v48  ;;  %v196_v3 = vld [vmem:[%s705_s4] sm:$0x3] }
  0x17   :  { %355 = vmatprep.subr.mxu1 %v239_v33  ;;  %293 = vmatpush1.msra.mxu0 %v262_v50  ;;  %v201_v6 = vrot.slane %v196_v3, %v200_v2  ;;  %v412_v22 = vld [vmem:[%s706_s7] sm:$0x3] }
  0x18   :  { %356 = vmatpush1.msra.mxu1 %v238_v34  ;;  %294 = vmatprep.subr.mxu0 %v261_v52  ;;  %v417_v24 = vrot.slane %v412_v22, %v200_v2  ;;  %v421_v27 = vrot.slane %v412_v22, %v204_v4 }
  0x19   :  { %357 = vmatprep.subr.mxu1 %v237_v35  ;;  %295 = vmatpush1.msra.mxu0 %v260_v53 }
  0x1a   :  { %358 = vmatpush1.msra.mxu1 %v236_v36  ;;  %296 = vmatprep.subr.mxu0 %v259_v55 }
  0x1b   :  { %359 = vmatprep.subr.mxu1 %v235_v37  ;;  %297 = vmatpush1.msra.mxu0 %v258_v57 }
  0x1c   :  { %360 = vmatpush1.msra.mxu1 %v234_v38  ;;  %437 = vmatmul.mubr.msk.f32.vlgmr.msra.gmra.mxu0 %vm47_vm0, %v521_v9  ;;  %v205_v9 = vrot.slane %v196_v3, %v204_v4 }
  0x1d   :  { %361 = vmatprep.subr.mxu1 %v233_v39 }
  0x1e   :  { %362 = vmatpush1.msra.mxu1 %v232_v40 }
  0x1f   :  { %363 = vmatprep.subr.mxu1 %v231_v41 }
  0x20   :  { %364 = vmatpush1.msra.mxu1 %v230_v42 }
  0x21   :  { %365 = vmatprep.subr.mxu1 %v229_v43 }
  0x22   :  { %366 = vmatpush1.msra.mxu1 %v228_v44 }
  0x23   :  { %367 = vmatprep.subr.mxu1 %v227_v46 }
  0x24   :  { %368 = vmatpush1.msra.mxu1 %v226_v49 }
  0x25   :  { %369 = vmatprep.subr.mxu1 %v225_v51 }
  0x26   :  { %370 = vmatpush1.msra.mxu1 %v224_v54 }
  0x27   :  { %371 = vmatprep.subr.mxu1 %v223_v56 }
  0x28   :  { %372 = vmatpush1.msra.mxu1 %v222_v58 }
  0x29   :  { %401 = vmatprep.subr.mxu1 %v257_v59 }
  0x2a   :  { %402 = vmatpush2.msra.mxu1 %v256_v60 }
  0x2b   :  { %403 = vmatprep.subr.mxu1 %v255_v61 }
  0x2c   :  { %404 = vmatpush2.msra.mxu1 %v254_v62 }
  0xca   :  { %v117_v1 = vpop.f32.mrf.mxu0 }
  0xcc   :  { %v119_v5 = vpop.f32.mrf.mxu0 }
  0xd2   :  { %v191_v7 = vpop.f32.mrf.mxu0 }
  0xd3   :  { %v192_v8 = vadd.f32 %v191_v7, %v117_v1 }
  0xd4   :  { %v193_v10 = vpop.f32.mrf.mxu0 }
  0xd5   :  { %v208_v11 = vadd.f32 %v201_v6, %v192_v8  ;;  %v194_v12 = vadd.f32 %v193_v10, %v119_v5 }
  0xd7   :  { %v435_v13 = vmul.f32 -1.442695, %v208_v11  ;;  %v209_v14 = vadd.f32 %v205_v9, %v194_v12 }
  0xd9   :  { %440 = vpow2.f32 %v435_v13  ;;  %v436_v15 = vmul.f32 -1.442695, %v209_v14 }
  0xdb   :  { %442 = vpow2.f32 %v436_v15 }
  0xdc   :  { %v332_v23 = vpop.f32.mrf.mxu0 }
  0xde   :  { %v334_v28 = vpop.f32.mrf.mxu0 }
  0xe6   :  { %v441_v16 = vpop.eup %440 }
  0xe7   :  { %v216_v18 = vadd.f32 1.0, %v441_v16 }
  0xe8   :  { %v443_v17 = vpop.eup %442 }
  0xe9   :  { %v217_v19 = vadd.f32 1.0, %v443_v17 }
  0xeb   :  { %444 = vrcp.f32 %v217_v19 }
  0xec   :  { %446 = vrcp.f32 %v216_v18 }
  0xf8   :  { %v445_v20 = vpop.eup %444 }
  0xf9   :  { %v447_v21 = vpop.eup %446  ;;  %438 = vmatprep.mubr.msk.f32.mxu1 %vm337_vm1, %v445_v20 }
  0xfa   :  { %406 = vmatmul.mubr.f32.vlgmr.msra.gmra.mxu1 %v447_v21 }
 0x1ba   :  { %v407_v25 = vpop.f32.mrf.mxu1 }
 0x1bb   :  { %v408_v26 = vadd.f32 %v407_v25, %v332_v23 }
 0x1bc   :  { %v409_v29 = vpop.f32.mrf.mxu1 }
 0x1bd   :  { %v424_v30 = vadd.f32 %v417_v24, %v408_v26  ;;  %v410_v31 = vadd.f32 %v409_v29, %v334_v28 }
 0x1bf   :  { %426 = vst [vmem:[%s707_s8] sm:$0xff] %v424_v30  ;;  %v425_v32 = vadd.f32 %v421_v27, %v410_v31 }
 0x1c1   :  { %428 = vst.msk [vmem:[%s707_s8 + $0x8] sm:$0xff] %vm427_vm2, %v425_v32 }

</bundles_post_ra>
